<compile_context>
chip_gen: v7x
topology: tpu7x:2x2x1
jax: 0.10.0
libtpu: 0.0.40
codegen_flags: <defaults>
</compile_context>

<pallas_src>
import jax
import jax.numpy as jnp
from jax.experimental import pallas as pl
from jax.experimental.pallas import tpu as pltpu

_LANES = 128
_SUBLANES = 8
_MAX_TILE_ROWS = 1024  # lane-dense rows per tile; (2,1024,128) f32 = 1 MiB/input,
                       # double-buffered x2 inputs ~ 4 MiB -> fits v5e/v6e/v7x.


def _softplus(d):
    # Numerically stable softplus; exact 0 for the -1e30 padding rows.
    return jnp.maximum(d, 0.0) + jnp.log(1.0 + jnp.exp(-jnp.abs(d)))


def _binary_loss_kernel(pos_ref, neg_ref, out_ref):
    # pos_ref / neg_ref: (2, TILE_ROWS, 128) lane-dense blocks.
    pos = pos_ref[...].astype(jnp.float32)
    neg = neg_ref[...].astype(jnp.float32)

    d_pos = pos[0] - pos[1]   # softplus(d_pos) == -log_softmax(pos)[:, 1]
    d_neg = neg[1] - neg[0]   # softplus(d_neg) == -log_softmax(neg)[:, 0]

    loss = _softplus(d_pos) + _softplus(d_neg)            # (TILE_ROWS, 128)

    # Per-lane partial sums: pure VPU vreg adds (no cross-lane XLU reduce here;
    # the single scalar reduction happens once in the wrapper).
    tr, lanes = loss.shape
    part = loss.reshape(tr // _SUBLANES, _SUBLANES, lanes).sum(axis=0)  # (8, 128)
    out_ref[0] = part


def binary_loss(pos_score, neg_score):
    """Scalar binary softmax cross-entropy loss (matches PyTorch BinaryLoss)."""
    assert pos_score.shape == neg_score.shape
    N, C = pos_score.shape
    assert C == 2, "softplus rewrite requires exactly two classes"
    dt = pos_score.dtype

    # --- choose a lane-dense tiling ---------------------------------------
    r_needed = -(-N // _LANES)                                   # lane-dense rows
    tile_rows = min(_MAX_TILE_ROWS, -(-r_needed // _SUBLANES) * _SUBLANES)
    rows_per_tile = tile_rows * _LANES                           # original rows/tile
    n_pad = -(-N // rows_per_tile) * rows_per_tile
    num_tiles = n_pad // rows_per_tile

    # --- pad tail with rows whose loss contribution is exactly 0 ----------
    pad = n_pad - N
    if pad > 0:
        big_neg = jnp.full((pad,), -1e30, dt)
        zeros = jnp.zeros((pad,), dt)
        # pos padding: pos0 - pos1 = -1e30 -> softplus == 0 exactly
        pos_fill = jnp.stack([big_neg, zeros], axis=1)
        # neg padding: neg1 - neg0 = -1e30 -> softplus == 0 exactly
        neg_fill = jnp.stack([zeros, big_neg], axis=1)
        pos_score = jnp.concatenate([pos_score, pos_fill], axis=0)
        neg_score = jnp.concatenate([neg_score, neg_fill], axis=0)

    # --- lane-dense layout: (N,2) -> (2, R, 128) ---------------------------
    R = n_pad // _LANES
    pos_l = pos_score.T.reshape(2, R, _LANES)
    neg_l = neg_score.T.reshape(2, R, _LANES)

    partials = pl.pallas_call(
        _binary_loss_kernel,
        out_shape=jax.ShapeDtypeStruct((num_tiles, _SUBLANES, _LANES), jnp.float32),
        grid=(num_tiles,),
        in_specs=[
            pl.BlockSpec((2, tile_rows, _LANES), lambda i: (0, i, 0)),
            pl.BlockSpec((2, tile_rows, _LANES), lambda i: (0, i, 0)),
        ],
        out_specs=pl.BlockSpec((1, _SUBLANES, _LANES), lambda i: (i, 0, 0)),
        compiler_params=pltpu.CompilerParams(
            dimension_semantics=("parallel",),      # shard tiles across TCs (v7x)
            vmem_limit_bytes=16 * 1024 * 1024,      # explicit, fits all generations
        ),
    )(pos_l, neg_l)

    # Single cross-lane reduction of the tiny partial-sum array.
    return jnp.sum(partials)


def _reference(pos_score, neg_score):
    pos_ls = jax.nn.log_softmax(pos_score.astype(jnp.float32), axis=1)
    neg_ls = jax.nn.log_softmax(neg_score.astype(jnp.float32), axis=1)
    return (-pos_ls[:, 1]).sum() + (-neg_ls[:, 0]).sum()


if __name__ == "__main__":
    key = jax.random.PRNGKey(0)
    k_pos, k_neg = jax.random.split(key)

    N = 8  # batch of sample pairs; each row is (-score, +score)
    pos_score = jax.random.normal(k_pos, (N, 2), dtype=jnp.float32)
    neg_score = jax.random.normal(k_neg, (N, 2), dtype=jnp.float32)

    loss = jax.block_until_ready(binary_loss(pos_score, neg_score))
    ref = jax.block_until_ready(_reference(pos_score, neg_score))

    assert jnp.allclose(loss, ref, rtol=1e-5, atol=1e-5), (loss, ref)
    print("KERNEL_OK")
</pallas_src>

<mosaic_0001>
module attributes {stable_mosaic.version = 11 : i64} {
  func.func @_binary_loss_kernel(%arg0: i32, %arg1: memref<2x8x128xf32, #tpu.memory_space<vmem>>, %arg2: memref<2x8x128xf32, #tpu.memory_space<vmem>>, %arg3: memref<1x8x128xf32, #tpu.memory_space<vmem>>) attributes {dimension_semantics = [#tpu.dimension_semantics<parallel>], iteration_bounds = array<i64: 1>, scalar_prefetch = 0 : i64, scratch_operands = 0 : i64, tpu.core_type = #tpu.core_type<tc>, window_params = [{transform_indices = @transform_0, window_bounds = array<i64: 2, 8, 128>}, {transform_indices = @transform_1, window_bounds = array<i64: 2, 8, 128>}, {transform_indices = @transform_2, window_bounds = array<i64: 1, 8, 128>}]} {
    %c0 = arith.constant 0 : index
    %c0_0 = arith.constant 0 : index
    %c0_1 = arith.constant 0 : index
    %0 = vector.load %arg1[%c0, %c0_0, %c0_1] : memref<2x8x128xf32, #tpu.memory_space<vmem>>, vector<2x8x128xf32>
    %c0_2 = arith.constant 0 : index
    %c0_3 = arith.constant 0 : index
    %c0_4 = arith.constant 0 : index
    %1 = vector.load %arg2[%c0_2, %c0_3, %c0_4] : memref<2x8x128xf32, #tpu.memory_space<vmem>>, vector<2x8x128xf32>
    %2 = vector.extract_strided_slice %0 {offsets = [0, 0, 0], sizes = [1, 8, 128], strides = [1, 1, 1]} : vector<2x8x128xf32> to vector<1x8x128xf32>
    %3 = vector.shape_cast %2 : vector<1x8x128xf32> to vector<8x128xf32>
    %4 = vector.extract_strided_slice %0 {offsets = [1, 0, 0], sizes = [1, 8, 128], strides = [1, 1, 1]} : vector<2x8x128xf32> to vector<1x8x128xf32>
    %5 = vector.shape_cast %4 : vector<1x8x128xf32> to vector<8x128xf32>
    %6 = arith.subf %3, %5 : vector<8x128xf32>
    %7 = vector.extract_strided_slice %1 {offsets = [1, 0, 0], sizes = [1, 8, 128], strides = [1, 1, 1]} : vector<2x8x128xf32> to vector<1x8x128xf32>
    %8 = vector.shape_cast %7 : vector<1x8x128xf32> to vector<8x128xf32>
    %9 = vector.extract_strided_slice %1 {offsets = [0, 0, 0], sizes = [1, 8, 128], strides = [1, 1, 1]} : vector<2x8x128xf32> to vector<1x8x128xf32>
    %10 = vector.shape_cast %9 : vector<1x8x128xf32> to vector<8x128xf32>
    %11 = arith.subf %8, %10 : vector<8x128xf32>
    %cst = arith.constant 0.000000e+00 : f32
    %12 = vector.broadcast %cst : f32 to vector<8x128xf32>
    %13 = arith.maximumf %6, %12 : vector<8x128xf32>
    %14 = math.absf %6 : vector<8x128xf32>
    %cst_5 = arith.constant 0.000000e+00 : f32
    %15 = vector.broadcast %cst_5 : f32 to vector<8x128xf32>
    %16 = arith.subf %15, %14 : vector<8x128xf32>
    %17 = math.exp %16 : vector<8x128xf32>
    %cst_6 = arith.constant 1.000000e+00 : f32
    %18 = vector.broadcast %cst_6 : f32 to vector<8x128xf32>
    %19 = arith.addf %18, %17 : vector<8x128xf32>
    %20 = math.log %19 : vector<8x128xf32>
    %21 = arith.addf %13, %20 : vector<8x128xf32>
    %cst_7 = arith.constant 0.000000e+00 : f32
    %22 = vector.broadcast %cst_7 : f32 to vector<8x128xf32>
    %23 = arith.maximumf %11, %22 : vector<8x128xf32>
    %24 = math.absf %11 : vector<8x128xf32>
    %cst_8 = arith.constant 0.000000e+00 : f32
    %25 = vector.broadcast %cst_8 : f32 to vector<8x128xf32>
    %26 = arith.subf %25, %24 : vector<8x128xf32>
    %27 = math.exp %26 : vector<8x128xf32>
    %cst_9 = arith.constant 1.000000e+00 : f32
    %28 = vector.broadcast %cst_9 : f32 to vector<8x128xf32>
    %29 = arith.addf %28, %27 : vector<8x128xf32>
    %30 = math.log %29 : vector<8x128xf32>
    %31 = arith.addf %23, %30 : vector<8x128xf32>
    %32 = arith.addf %21, %31 : vector<8x128xf32>
    %33 = vector.shape_cast %32 : vector<8x128xf32> to vector<1x8x128xf32>
    %cst_10 = arith.constant dense<0.000000e+00> : vector<8x128xf32>
    %34 = vector.multi_reduction <add>, %33, %cst_10 [0] : vector<1x8x128xf32> to vector<8x128xf32>
    %c0_11 = arith.constant 0 : index
    %c0_12 = arith.constant 0 : index
    %c0_13 = arith.constant 0 : index
    %35 = vector.load %arg3[%c0_11, %c0_12, %c0_13] : memref<1x8x128xf32, #tpu.memory_space<vmem>>, vector<1x8x128xf32>
    %36 = vector.shape_cast %35 : vector<1x8x128xf32> to vector<8x128xf32>
    %37 = vector.shape_cast %34 : vector<8x128xf32> to vector<1x8x128xf32>
    tpu.vector_store %arg3[%c0_11, %c0_12, %c0_13], %37 {strides = array<i32>} : memref<1x8x128xf32, #tpu.memory_space<vmem>>, vector<1x8x128xf32>,
    return
  }
  func.func @transform_0(%arg0: i32) -> (i32, i32, i32) {
    %c0_i32 = arith.constant 0 : i32
    %c0_i32_0 = arith.constant 0 : i32
    %c0_i32_1 = arith.constant 0 : i32
    return %c0_i32, %arg0, %c0_i32_0 : i32, i32, i32
  }
  func.func @transform_1(%arg0: i32) -> (i32, i32, i32) {
    %c0_i32 = arith.constant 0 : i32
    %c0_i32_0 = arith.constant 0 : i32
    %c0_i32_1 = arith.constant 0 : i32
    return %c0_i32, %arg0, %c0_i32_0 : i32, i32, i32
  }
  func.func @transform_2(%arg0: i32) -> (i32, i32, i32) {
    %c0_i32 = arith.constant 0 : i32
    %c0_i32_0 = arith.constant 0 : i32
    %c0_i32_1 = arith.constant 0 : i32
    return %arg0, %c0_i32, %c0_i32_0 : i32, i32, i32
  }
}

</mosaic_0001>

<bundles_post_ra>
// kernel: tpu_custom_call.1
= control target key start
LH: loop header
LB: loop body
LE: loop exit
PB: predicated region body
PF: predicated region fallthrough
CT: control target
= control target key end

     0   :  { %7 = vsyncpa [#allocation3], 0  ;;  %s224_s0 = inlined_call_operand.hbm [shape: f32[2,8,128], index: 0, kind: input, shape index: {}]   ;;  %s225_s1 = inlined_call_operand.hbm [shape: f32[2,8,128], index: 1, kind: input, shape index: {}]   ;;  %s226_s2 = inlined_call_operand.hbm [shape: f32[1,8,128], index: 2, kind: output, shape index: {}]  }
   0x1   :  { %8 = vsyncpa [#allocation6], 0 }
   0x2   :  { %9 = vsyncpa [#allocation4], 0  ;;  %s168_s9 = smov [#allocation2]   ;;  %s96_s13 = scalar_lea.hbm %s224_s0, 256 }
   0x3   :  { %s15_s10 = sshll.u32 %s168_s9, 4  ;;  %p97_p0 = scmp.ne.s32.totalorder %s224_s0, %s96_s13  ;;  %s16_s10 = int_to_ptr.vmem [resolvable:$true] %s15_s10 }
   0x4   :  { %p100_p1 = scmp.lt.u32.totalorder %s96_s13, %s224_s0 }
   0x6   :  { %p102_p2 = pnand %p100_p1, %p97_p0 }
   0x8   :  { %105 = shalt.err (!%p102_p2)
}
   0x9   :  { %s106_s18 = scalar_lea.vmem %s16_s10, 256  ;;  %p111_p4 = scmp.lt.s32.totalorder %s16_s10, %s16_s10 }
   0xa   :  { %p107_p3 = scmp.ne.s32.totalorder %s16_s10, %s106_s18  ;;  %p112_p5 = scmp.lt.s32.totalorder %s106_s18, %s106_s18 }
   0xc   :  { %p113_p6 = por %p112_p5, %p111_p4 }
   0xe   :  { %p114_p7 = pnand %p113_p6, %p107_p3 }
  0x10   :  { %117 = shalt.err (!%p114_p7)
}
  0x11   :  { %s169_s19 = smov 128   ;;  %s170_s20 = smov 8  }
  0x12   :  { %21 = dma.hbm_to_vmem [thread:$0]  %s224_s0, 256, %s16_s10, [#allocation3], %s169_s19, %s169_s19, %s170_s20  }
  0x13   :  { %s171_s23 = smov [#allocation5]   ;;  %s118_s27 = scalar_lea.hbm %s225_s1, 256 }
  0x14   :  { %s27_s24 = sshll.u32 %s171_s23, 4  ;;  %p119_p8 = scmp.ne.s32.totalorder %s225_s1, %s118_s27  ;;  %s28_s24 = int_to_ptr.vmem [resolvable:$true] %s27_s24 }
  0x15   :  { %p122_p9 = scmp.lt.u32.totalorder %s118_s27, %s225_s1 }
  0x17   :  { %p124_p10 = pnand %p122_p9, %p119_p8 }
  0x19   :  { %127 = shalt.err (!%p124_p10)
}
  0x1a   :  { %s128_s4 = scalar_lea.vmem %s28_s24, 256  ;;  %p133_p12 = scmp.lt.s32.totalorder %s28_s24, %s28_s24 }
  0x1b   :  { %p129_p11 = scmp.ne.s32.totalorder %s28_s24, %s128_s4  ;;  %p134_p13 = scmp.lt.s32.totalorder %s128_s4, %s128_s4 }
  0x1d   :  { %p135_p0 = por %p134_p13, %p133_p12 }
  0x1f   :  { %p136_p1 = pnand %p135_p0, %p129_p11 }
  0x21   :  { %139 = shalt.err (!%p136_p1)
}
  0x22   :  { %33 = dma.hbm_to_vmem [thread:$0]  %s225_s1, 256, %s28_s24, [#allocation6], %s169_s19, %s169_s19, %s170_s20  }
  0x23   :  { %162 = dma.done.wait [#allocation3], 256  }
  0x24   :  { %163 = vsyncadd [#allocation3], 4294967040 }
  0x25   :  { %164 = dma.done.wait [#allocation6], 256  }
  0x26   :  { %165 = vsyncadd [#allocation6], 4294967040  ;;  %v40_v0 = vld [vmem:[#allocation2] sm:$0xff]  ;;  %v41_v1 = vld [vmem:[#allocation2 + $0x8] sm:$0xff]  ;;  %s172_s1 = smov [#allocation7]  }
  0x27   :  { %v42_v2 = vld [vmem:[#allocation5] sm:$0xff]  ;;  %v43_v3 = vld [vmem:[#allocation5 + $0x8] sm:$0xff]  ;;  %v44_v4 = vsub.f32 %v40_v0, %v41_v1  ;;  %s73_s6 = sshll.u32 %s172_s1, 4  ;;  %s74_s6 = int_to_ptr.vmem [resolvable:$true] %s73_s6 }
  0x28   :  { %v45_v5 = vsub.f32 %v43_v3, %v42_v2  ;;  %s140_s7 = scalar_lea.vmem %s74_s6, 128  ;;  %p145_p3 = scmp.lt.s32.totalorder %s74_s6, %s74_s6 }
  0x29   :  { %v47_v6 = vand.u32 2147483647, %v44_v4  ;;  %v46_v16 = vmax.f32 %v44_v4, 0.0  ;;  %p141_p2 = scmp.ne.s32.totalorder %s74_s6, %s140_s7  ;;  %p146_p4 = scmp.lt.s32.totalorder %s140_s7, %s140_s7 }
  0x2a   :  { %v56_v7 = vand.u32 2147483647, %v45_v5  ;;  %v55_v18 = vmax.f32 %v45_v5, 0.0 }
  0x2b   :  { %v48_v8 = vsub.f32 0.0, %v47_v6  ;;  %p147_p5 = por %p146_p4, %p145_p3 }
  0x2c   :  { %v57_v9 = vsub.f32 0.0, %v56_v7 }
  0x2d   :  { %v49_v10 = vmul.f32 1.442695, %v48_v8  ;;  %p148_p6 = pnand %p147_p5, %p141_p2 }
  0x2e   :  { %v58_v11 = vmul.f32 1.442695, %v57_v9 }
  0x2f   :  { %88 = vpow2.f32 %v49_v10 }
  0x30   :  { %90 = vpow2.f32 %v58_v11 }
  0x39   :  { %v89_v12 = vpop.eup %88 }
  0x3a   :  { %v91_v13 = vpop.eup %90  ;;  %v51_v14 = vadd.f32 1.0, %v89_v12 }
  0x3b   :  { %v60_v15 = vadd.f32 1.0, %v91_v13 }
  0x3c   :  { %92 = vlog2.f32 %v51_v14 }
  0x3d   :  { %94 = vlog2.f32 %v60_v15 }
  0x46   :  { %v93_v17 = vpop.eup %92 }
  0x47   :  { %v95_v19 = vpop.eup %94  ;;  %v53_v20 = vmul.f32 0.6931472, %v93_v17 }
  0x48   :  { %v62_v21 = vmul.f32 0.6931472, %v95_v19 }
  0x49   :  { %v54_v22 = vadd.f32 %v53_v20, %v46_v16 }
  0x4a   :  { %v63_v23 = vadd.f32 %v62_v21, %v55_v18 }
  0x4c   :  { %v64_v24 = vadd.f32 %v63_v23, %v54_v22 }
  0x4e   :  { %66 = vst [vmem:[#allocation7] sm:$0xff] %v64_v24 }
  0x4f   :  { %151 = shalt.err (!%p148_p6)
}
  0x50   :  { %s152_s10 = scalar_lea.hbm %s226_s2, 128 }
  0x51   :  { %p153_p7 = scmp.ne.s32.totalorder %s226_s2, %s152_s10  ;;  %p156_p8 = scmp.lt.u32.totalorder %s152_s10, %s226_s2 }
  0x53   :  { %p158_p9 = pnand %p156_p8, %p153_p7 }
  0x55   :  { %161 = shalt.err (!%p158_p9)
}
  0x56   :  { %76 = dma.vmem_to_hbm [thread:$0]  %s74_s6, 128, %s226_s2, [#allocation4]  }
  0x57   :  { %166 = dma.done.wait [#allocation4], 128  }
  0x58   :  { %167 = vsyncadd [#allocation4], 4294967168 }
  0x59   :  { %80 = vsyncpa [#allocation3], 1 }
  0x5a   :  { %81 = vsyncpa [#allocation6], 1 }
  0x5b   :  { %82 = vsyncpa [#allocation4], 1 }

</bundles_post_ra>
